<compile_context>
chip_gen: v5e
topology: v5e:2x2
jax: 0.10.0
libtpu: 0.0.40
codegen_flags: <defaults>
</compile_context>

<pallas_src>
import functools

import jax
import jax.numpy as jnp
from jax.experimental import pallas as pl
from jax.experimental.pallas import tpu as pltpu


def _round_up(x, m):
    return (x + m - 1) // m * m


# ---------------------------------------------------------------------------
# Fused decoder kernel: input projection + LSTM recurrence + vocab projection
# ---------------------------------------------------------------------------
def decoder_kernel(x_ref, wih_ref, whh_ref, b_ref, wlin_ref, blin_ref,
                   out_ref, gx_sc, hseq_sc, h_sc, c_sc, *, seq_len, n_batch):
    S, N = seq_len, n_batch
    Hp = whh_ref.shape[0]                    # lane-padded hidden size

    # ---- Hoisted input projection: one MXU matmul for ALL timesteps. ----
    gx_sc[...] = (
        jnp.dot(x_ref[...], wih_ref[...], preferred_element_type=jnp.float32)
        + b_ref[...]
    )                                        # (S*N, 4*Hp), gate order i,f,g,o

    h_sc[...] = jnp.zeros_like(h_sc)
    c_sc[...] = jnp.zeros_like(c_sc)

    def step(t):
        row = t * N
        # Serial critical path: a single (N, Hp) @ (Hp, 4*Hp) matmul + gates.
        gates = gx_sc[pl.ds(row, N), :] + jnp.dot(
            h_sc[...], whh_ref[...], preferred_element_type=jnp.float32)
        # 128-lane-aligned gate slices (Hp is a multiple of 128).
        i_g = jax.nn.sigmoid(gates[:, 0 * Hp:1 * Hp])
        f_g = jax.nn.sigmoid(gates[:, 1 * Hp:2 * Hp])
        g_g = jnp.tanh(gates[:, 2 * Hp:3 * Hp])
        o_g = jax.nn.sigmoid(gates[:, 3 * Hp:4 * Hp])
        c_new = f_g * c_sc[...] + i_g * g_g
        h_new = o_g * jnp.tanh(c_new)
        c_sc[...] = c_new
        h_sc[...] = h_new
        hseq_sc[pl.ds(row, N), :] = h_new    # h_seq stays in VMEM

    if S <= 16:
        # Trace-time unroll (== fori_loop(..., unroll=True)) gives the LLO
        # scheduler full cross-step visibility for short sequences.
        for t in range(S):
            step(t)
    else:
        def body(t, carry):
            step(t)
            return carry
        jax.lax.fori_loop(0, S, body, 0)

    # ---- Fused vocab projection, lane-dense (Vp multiple of 128). ----
    out_ref[...] = (
        jnp.dot(hseq_sc[...], wlin_ref[...], preferred_element_type=jnp.float32)
        + blin_ref[...]
    ).astype(out_ref.dtype)


# ---------------------------------------------------------------------------
# Wrapper: glue (embedding + concat) in XLA, everything else in the kernel
# ---------------------------------------------------------------------------
def decoder_rnn_forward(params, features, captions, *, lane=128):
    # Glue exactly as the PyTorch module.
    emb = jnp.take(params["embedding"], captions[:, :-1], axis=0)   # (B, L-1, E)
    x = jnp.concatenate([features[:, None, :], emb], axis=1)        # (B, L, E)
    # nn.LSTM (batch_first=False): time axis = B, batch axis = L.
    S, N, E = x.shape
    H = params["w_hh"].shape[1]
    V = params["w_lin"].shape[0]
    Hp = _round_up(H, lane)
    Vp = _round_up(V, lane)
    f32 = jnp.float32

    # Zero-pad hidden/vocab to 128 lanes; each PyTorch gate block (i,f,g,o) is
    # placed at a 128-aligned column offset.  Padding is mathematically inert.
    wih_p = jnp.zeros((E, 4, Hp), f32).at[:, :, :H].set(
        params["w_ih"].astype(f32).T.reshape(E, 4, H)).reshape(E, 4 * Hp)
    whh_p = jnp.zeros((Hp, 4, Hp), f32).at[:H, :, :H].set(
        params["w_hh"].astype(f32).T.reshape(H, 4, H)).reshape(Hp, 4 * Hp)
    b_p = jnp.zeros((4, Hp), f32).at[:, :H].set(
        (params["b_ih"] + params["b_hh"]).astype(f32).reshape(4, H)
    ).reshape(1, 4 * Hp)
    wlin_p = jnp.zeros((Hp, Vp), f32).at[:H, :V].set(params["w_lin"].astype(f32).T)
    blin_p = jnp.zeros((1, Vp), f32).at[0, :V].set(params["b_lin"].astype(f32))

    x2d = x.reshape(S * N, E).astype(f32)

    # TODO(synk): nn.LSTM dropout=0.1 is a no-op for num_layers=1 (and eval).
    kernel = functools.partial(decoder_kernel, seq_len=S, n_batch=N)
    out2d = pl.pallas_call(
        kernel,
        out_shape=jax.ShapeDtypeStruct((S * N, Vp), f32),
        grid_spec=pltpu.PrefetchScalarGridSpec(
            num_scalar_prefetch=0,
            grid=(1,),                               # whole forward, one grid point
            in_specs=[
                pl.BlockSpec((S * N, E), lambda i: (0, 0)),       # x
                pl.BlockSpec((E, 4 * Hp), lambda i: (0, 0)),      # W_ih^T (padded)
                pl.BlockSpec((Hp, 4 * Hp), lambda i: (0, 0)),     # W_hh^T (padded)
                pl.BlockSpec((1, 4 * Hp), lambda i: (0, 0)),      # fused bias
                pl.BlockSpec((Hp, Vp), lambda i: (0, 0)),         # W_lin^T (padded)
                pl.BlockSpec((1, Vp), lambda i: (0, 0)),          # b_lin (padded)
            ],
            out_specs=pl.BlockSpec((S * N, Vp), lambda i: (0, 0)),
            scratch_shapes=[
                pltpu.VMEM((S * N, 4 * Hp), jnp.float32),  # hoisted gates_x
                pltpu.VMEM((S * N, Hp), jnp.float32),      # h sequence (VMEM only)
                pltpu.VMEM((N, Hp), jnp.float32),          # h_t
                pltpu.VMEM((N, Hp), jnp.float32),          # c_t
            ],
        ),
        compiler_params=pltpu.CompilerParams(
            dimension_semantics=("arbitrary",),
        ),
    )(x2d, wih_p, whh_p, b_p, wlin_p, blin_p)

    # Strip lane padding, restore (B, L, V) like the PyTorch module.
    return out2d[:, :V].reshape(S, N, V)


# ---------------------------------------------------------------------------
# Pure-JAX reference (for correctness check)
# ---------------------------------------------------------------------------
def reference_forward(params, features, captions):
    emb = jnp.take(params["embedding"], captions[:, :-1], axis=0)
    x = jnp.concatenate([features[:, None, :], emb], axis=1)           # (S, N, E)
    S, N, _ = x.shape
    H = params["w_hh"].shape[1]
    h = jnp.zeros((N, H), jnp.float32)
    c = jnp.zeros((N, H), jnp.float32)
    bias = params["b_ih"] + params["b_hh"]
    outs = []
    for t in range(S):
        gates = x[t] @ params["w_ih"].T + h @ params["w_hh"].T + bias
        i = jax.nn.sigmoid(gates[:, 0 * H:1 * H])
        f = jax.nn.sigmoid(gates[:, 1 * H:2 * H])
        g = jnp.tanh(gates[:, 2 * H:3 * H])
        o = jax.nn.sigmoid(gates[:, 3 * H:4 * H])
        c = f * c + i * g
        h = o * jnp.tanh(c)
        outs.append(h)
    hseq = jnp.stack(outs, axis=0)
    return hseq @ params["w_lin"].T + params["b_lin"]


# ---------------------------------------------------------------------------
# Main
# ---------------------------------------------------------------------------
if __name__ == "__main__":
    embed_size, hidden_size, vocab_size = 32, 32, 64
    batch, caption_len = 2, 8

    key = jax.random.PRNGKey(0)
    ks = jax.random.split(key, 9)
    s = 1.0 / jnp.sqrt(hidden_size)

    params = {
        "embedding": jax.random.normal(ks[0], (vocab_size, embed_size), jnp.float32),
        "w_ih": jax.random.uniform(ks[1], (4 * hidden_size, embed_size), jnp.float32, -s, s),
        "w_hh": jax.random.uniform(ks[2], (4 * hidden_size, hidden_size), jnp.float32, -s, s),
        "b_ih": jax.random.uniform(ks[3], (4 * hidden_size,), jnp.float32, -s, s),
        "b_hh": jax.random.uniform(ks[4], (4 * hidden_size,), jnp.float32, -s, s),
        "w_lin": jax.random.uniform(ks[5], (vocab_size, hidden_size), jnp.float32, -s, s),
        "b_lin": jax.random.uniform(ks[6], (vocab_size,), jnp.float32, -s, s),
    }

    features = jax.random.normal(ks[7], (batch, embed_size), jnp.float32)
    captions = jax.random.randint(ks[8], (batch, caption_len), 0, vocab_size, jnp.int32)

    out = decoder_rnn_forward(params, features, captions)
    out = jax.block_until_ready(out)

    ref = reference_forward(params, features, captions)
    assert out.shape == (batch, caption_len, vocab_size), out.shape
    assert jnp.allclose(out, ref, atol=1e-4, rtol=1e-4), float(jnp.max(jnp.abs(out - ref)))

    print("KERNEL_OK")
</pallas_src>

<mosaic_0001>
module attributes {stable_mosaic.version = 11 : i64} {
  func.func @decoder_kernel(%arg0: i32, %arg1: memref<16x32xf32, #tpu.memory_space<vmem>>, %arg2: memref<32x512xf32, #tpu.memory_space<vmem>>, %arg3: memref<128x512xf32, #tpu.memory_space<vmem>>, %arg4: memref<1x512xf32, #tpu.memory_space<vmem>>, %arg5: memref<128x128xf32, #tpu.memory_space<vmem>>, %arg6: memref<1x128xf32, #tpu.memory_space<vmem>>, %arg7: memref<16x128xf32, #tpu.memory_space<vmem>>, %arg8: memref<16x512xf32, #tpu.memory_space<vmem>>, %arg9: memref<16x128xf32, #tpu.memory_space<vmem>>, %arg10: memref<8x128xf32, #tpu.memory_space<vmem>>, %arg11: memref<8x128xf32, #tpu.memory_space<vmem>>) attributes {dimension_semantics = [#tpu.dimension_semantics<arbitrary>], iteration_bounds = array<i64: 1>, scalar_prefetch = 0 : i64, scratch_operands = 4 : i64, tpu.core_type = #tpu.core_type<tc>, window_params = [{pipeline_mode = #tpu.pipeline_mode<synchronous>, transform_indices = @transform_0, window_bounds = array<i64: 16, 32>}, {pipeline_mode = #tpu.pipeline_mode<synchronous>, transform_indices = @transform_1, window_bounds = array<i64: 32, 512>}, {pipeline_mode = #tpu.pipeline_mode<synchronous>, transform_indices = @transform_2, window_bounds = array<i64: 128, 512>}, {pipeline_mode = #tpu.pipeline_mode<synchronous>, transform_indices = @transform_3, window_bounds = array<i64: 1, 512>}, {pipeline_mode = #tpu.pipeline_mode<synchronous>, transform_indices = @transform_4, window_bounds = array<i64: 128, 128>}, {pipeline_mode = #tpu.pipeline_mode<synchronous>, transform_indices = @transform_5, window_bounds = array<i64: 1, 128>}, {pipeline_mode = #tpu.pipeline_mode<synchronous>, transform_indices = @transform_6, window_bounds = array<i64: 16, 128>}]} {
    %c0 = arith.constant 0 : index
    %c0_0 = arith.constant 0 : index
    %0 = vector.load %arg1[%c0, %c0_0] : memref<16x32xf32, #tpu.memory_space<vmem>>, vector<16x32xf32>
    %c0_1 = arith.constant 0 : index
    %c0_2 = arith.constant 0 : index
    %1 = vector.load %arg2[%c0_1, %c0_2] : memref<32x512xf32, #tpu.memory_space<vmem>>, vector<32x512xf32>
    %cst = arith.constant dense<0.000000e+00> : vector<16x512xf32>
    %2 = tpu.matmul %0, %1, %cst {dimension_numbers = #tpu.dot_dimension_numbers<[1], [0], [0], [1], [0, 0, 1, 1], [], []>} : vector<16x32xf32>, vector<32x512xf32>, vector<16x512xf32> -> vector<16x512xf32>
    %c0_3 = arith.constant 0 : index
    %c0_4 = arith.constant 0 : index
    %3 = vector.load %arg4[%c0_3, %c0_4] : memref<1x512xf32, #tpu.memory_space<vmem>>, vector<1x512xf32>
    %4 = vector.broadcast %3 : vector<1x512xf32> to vector<16x512xf32>
    %5 = arith.addf %2, %4 : vector<16x512xf32>
    %c0_5 = arith.constant 0 : index
    %c0_6 = arith.constant 0 : index
    %6 = vector.load %arg8[%c0_5, %c0_6] : memref<16x512xf32, #tpu.memory_space<vmem>>, vector<16x512xf32>
    tpu.vector_store %arg8[%c0_5, %c0_6], %5 {strides = array<i32>} : memref<16x512xf32, #tpu.memory_space<vmem>>, vector<16x512xf32>,
    %cst_7 = arith.constant 0.000000e+00 : f32
    %7 = vector.broadcast %cst_7 : f32 to vector<8x128xf32>
    %c0_8 = arith.constant 0 : index
    %c0_9 = arith.constant 0 : index
    %8 = vector.load %arg10[%c0_8, %c0_9] : memref<8x128xf32, #tpu.memory_space<vmem>>, vector<8x128xf32>
    tpu.vector_store %arg10[%c0_8, %c0_9], %7 {strides = array<i32>} : memref<8x128xf32, #tpu.memory_space<vmem>>, vector<8x128xf32>,
    %cst_10 = arith.constant 0.000000e+00 : f32
    %9 = vector.broadcast %cst_10 : f32 to vector<8x128xf32>
    %c0_11 = arith.constant 0 : index
    %c0_12 = arith.constant 0 : index
    %10 = vector.load %arg11[%c0_11, %c0_12] : memref<8x128xf32, #tpu.memory_space<vmem>>, vector<8x128xf32>
    tpu.vector_store %arg11[%c0_11, %c0_12], %9 {strides = array<i32>} : memref<8x128xf32, #tpu.memory_space<vmem>>, vector<8x128xf32>,
    %c0_13 = arith.constant 0 : index
    %c0_14 = arith.constant 0 : index
    %11 = vector.load %arg8[%c0_13, %c0_14] : memref<16x512xf32, #tpu.memory_space<vmem>>, vector<8x512xf32>
    %c0_15 = arith.constant 0 : index
    %c0_16 = arith.constant 0 : index
    %12 = vector.load %arg10[%c0_15, %c0_16] : memref<8x128xf32, #tpu.memory_space<vmem>>, vector<8x128xf32>
    %c0_17 = arith.constant 0 : index
    %c0_18 = arith.constant 0 : index
    %13 = vector.load %arg3[%c0_17, %c0_18] : memref<128x512xf32, #tpu.memory_space<vmem>>, vector<128x512xf32>
    %cst_19 = arith.constant dense<0.000000e+00> : vector<8x512xf32>
    %14 = tpu.matmul %12, %13, %cst_19 {dimension_numbers = #tpu.dot_dimension_numbers<[1], [0], [0], [1], [0, 0, 1, 1], [], []>} : vector<8x128xf32>, vector<128x512xf32>, vector<8x512xf32> -> vector<8x512xf32>
    %15 = arith.addf %11, %14 : vector<8x512xf32>
    %16 = vector.extract_strided_slice %15 {offsets = [0, 0], sizes = [8, 128], strides = [1, 1]} : vector<8x512xf32> to vector<8x128xf32>
    %17 = arith.negf %16 : vector<8x128xf32>
    %18 = math.exp %17 : vector<8x128xf32>
    %cst_20 = arith.constant 1.000000e+00 : f32
    %19 = vector.broadcast %cst_20 : f32 to vector<8x128xf32>
    %20 = arith.addf %19, %18 : vector<8x128xf32>
    %21 = arith.divf %19, %20 : vector<8x128xf32>
    %22 = vector.extract_strided_slice %15 {offsets = [0, 128], sizes = [8, 128], strides = [1, 1]} : vector<8x512xf32> to vector<8x128xf32>
    %23 = arith.negf %22 : vector<8x128xf32>
    %24 = math.exp %23 : vector<8x128xf32>
    %cst_21 = arith.constant 1.000000e+00 : f32
    %25 = vector.broadcast %cst_21 : f32 to vector<8x128xf32>
    %26 = arith.addf %25, %24 : vector<8x128xf32>
    %27 = arith.divf %25, %26 : vector<8x128xf32>
    %28 = vector.extract_strided_slice %15 {offsets = [0, 256], sizes = [8, 128], strides = [1, 1]} : vector<8x512xf32> to vector<8x128xf32>
    %29 = math.tanh %28 : vector<8x128xf32>
    %30 = vector.extract_strided_slice %15 {offsets = [0, 384], sizes = [8, 128], strides = [1, 1]} : vector<8x512xf32> to vector<8x128xf32>
    %31 = arith.negf %30 : vector<8x128xf32>
    %32 = math.exp %31 : vector<8x128xf32>
    %cst_22 = arith.constant 1.000000e+00 : f32
    %33 = vector.broadcast %cst_22 : f32 to vector<8x128xf32>
    %34 = arith.addf %33, %32 : vector<8x128xf32>
    %35 = arith.divf %33, %34 : vector<8x128xf32>
    %c0_23 = arith.constant 0 : index
    %c0_24 = arith.constant 0 : index
    %36 = vector.load %arg11[%c0_23, %c0_24] : memref<8x128xf32, #tpu.memory_space<vmem>>, vector<8x128xf32>
    %37 = arith.mulf %27, %36 : vector<8x128xf32>
    %38 = arith.mulf %21, %29 : vector<8x128xf32>
    %39 = arith.addf %37, %38 : vector<8x128xf32>
    %40 = math.tanh %39 : vector<8x128xf32>
    %41 = arith.mulf %35, %40 : vector<8x128xf32>
    %c0_25 = arith.constant 0 : index
    %c0_26 = arith.constant 0 : index
    %42 = vector.load %arg11[%c0_25, %c0_26] : memref<8x128xf32, #tpu.memory_space<vmem>>, vector<8x128xf32>
    tpu.vector_store %arg11[%c0_25, %c0_26], %39 {strides = array<i32>} : memref<8x128xf32, #tpu.memory_space<vmem>>, vector<8x128xf32>,
    %c0_27 = arith.constant 0 : index
    %c0_28 = arith.constant 0 : index
    %43 = vector.load %arg10[%c0_27, %c0_28] : memref<8x128xf32, #tpu.memory_space<vmem>>, vector<8x128xf32>
    tpu.vector_store %arg10[%c0_27, %c0_28], %41 {strides = array<i32>} : memref<8x128xf32, #tpu.memory_space<vmem>>, vector<8x128xf32>,
    %c0_29 = arith.constant 0 : index
    %c0_30 = arith.constant 0 : index
    %44 = vector.load %arg9[%c0_29, %c0_30] : memref<16x128xf32, #tpu.memory_space<vmem>>, vector<8x128xf32>
    tpu.vector_store %arg9[%c0_29, %c0_30], %41 {strides = array<i32>} : memref<16x128xf32, #tpu.memory_space<vmem>>, vector<8x128xf32>,
    %c8 = arith.constant 8 : index
    %c0_31 = arith.constant 0 : index
    %45 = vector.load %arg8[%c8, %c0_31] : memref<16x512xf32, #tpu.memory_space<vmem>>, vector<8x512xf32>
    %c0_32 = arith.constant 0 : index
    %c0_33 = arith.constant 0 : index
    %46 = vector.load %arg10[%c0_32, %c0_33] : memref<8x128xf32, #tpu.memory_space<vmem>>, vector<8x128xf32>
    %c0_34 = arith.constant 0 : index
    %c0_35 = arith.constant 0 : index
    %47 = vector.load %arg3[%c0_34, %c0_35] : memref<128x512xf32, #tpu.memory_space<vmem>>, vector<128x512xf32>
    %cst_36 = arith.constant dense<0.000000e+00> : vector<8x512xf32>
    %48 = tpu.matmul %46, %47, %cst_36 {dimension_numbers = #tpu.dot_dimension_numbers<[1], [0], [0], [1], [0, 0, 1, 1], [], []>} : vector<8x128xf32>, vector<128x512xf32>, vector<8x512xf32> -> vector<8x512xf32>
    %49 = arith.addf %45, %48 : vector<8x512xf32>
    %50 = vector.extract_strided_slice %49 {offsets = [0, 0], sizes = [8, 128], strides = [1, 1]} : vector<8x512xf32> to vector<8x128xf32>
    %51 = arith.negf %50 : vector<8x128xf32>
    %52 = math.exp %51 : vector<8x128xf32>
    %cst_37 = arith.constant 1.000000e+00 : f32
    %53 = vector.broadcast %cst_37 : f32 to vector<8x128xf32>
    %54 = arith.addf %53, %52 : vector<8x128xf32>
    %55 = arith.divf %53, %54 : vector<8x128xf32>
    %56 = vector.extract_strided_slice %49 {offsets = [0, 128], sizes = [8, 128], strides = [1, 1]} : vector<8x512xf32> to vector<8x128xf32>
    %57 = arith.negf %56 : vector<8x128xf32>
    %58 = math.exp %57 : vector<8x128xf32>
    %cst_38 = arith.constant 1.000000e+00 : f32
    %59 = vector.broadcast %cst_38 : f32 to vector<8x128xf32>
    %60 = arith.addf %59, %58 : vector<8x128xf32>
    %61 = arith.divf %59, %60 : vector<8x128xf32>
    %62 = vector.extract_strided_slice %49 {offsets = [0, 256], sizes = [8, 128], strides = [1, 1]} : vector<8x512xf32> to vector<8x128xf32>
    %63 = math.tanh %62 : vector<8x128xf32>
    %64 = vector.extract_strided_slice %49 {offsets = [0, 384], sizes = [8, 128], strides = [1, 1]} : vector<8x512xf32> to vector<8x128xf32>
    %65 = arith.negf %64 : vector<8x128xf32>
    %66 = math.exp %65 : vector<8x128xf32>
    %cst_39 = arith.constant 1.000000e+00 : f32
    %67 = vector.broadcast %cst_39 : f32 to vector<8x128xf32>
    %68 = arith.addf %67, %66 : vector<8x128xf32>
    %69 = arith.divf %67, %68 : vector<8x128xf32>
    %c0_40 = arith.constant 0 : index
    %c0_41 = arith.constant 0 : index
    %70 = vector.load %arg11[%c0_40, %c0_41] : memref<8x128xf32, #tpu.memory_space<vmem>>, vector<8x128xf32>
    %71 = arith.mulf %61, %70 : vector<8x128xf32>
    %72 = arith.mulf %55, %63 : vector<8x128xf32>
    %73 = arith.addf %71, %72 : vector<8x128xf32>
    %74 = math.tanh %73 : vector<8x128xf32>
    %75 = arith.mulf %69, %74 : vector<8x128xf32>
    %c0_42 = arith.constant 0 : index
    %c0_43 = arith.constant 0 : index
    %76 = vector.load %arg11[%c0_42, %c0_43] : memref<8x128xf32, #tpu.memory_space<vmem>>, vector<8x128xf32>
    tpu.vector_store %arg11[%c0_42, %c0_43], %73 {strides = array<i32>} : memref<8x128xf32, #tpu.memory_space<vmem>>, vector<8x128xf32>,
    %c0_44 = arith.constant 0 : index
    %c0_45 = arith.constant 0 : index
    %77 = vector.load %arg10[%c0_44, %c0_45] : memref<8x128xf32, #tpu.memory_space<vmem>>, vector<8x128xf32>
    tpu.vector_store %arg10[%c0_44, %c0_45], %75 {strides = array<i32>} : memref<8x128xf32, #tpu.memory_space<vmem>>, vector<8x128xf32>,
    %c8_46 = arith.constant 8 : index
    %c0_47 = arith.constant 0 : index
    %78 = vector.load %arg9[%c8_46, %c0_47] : memref<16x128xf32, #tpu.memory_space<vmem>>, vector<8x128xf32>
    tpu.vector_store %arg9[%c8_46, %c0_47], %75 {strides = array<i32>} : memref<16x128xf32, #tpu.memory_space<vmem>>, vector<8x128xf32>,
    %c0_48 = arith.constant 0 : index
    %c0_49 = arith.constant 0 : index
    %79 = vector.load %arg9[%c0_48, %c0_49] : memref<16x128xf32, #tpu.memory_space<vmem>>, vector<16x128xf32>
    %c0_50 = arith.constant 0 : index
    %c0_51 = arith.constant 0 : index
    %80 = vector.load %arg5[%c0_50, %c0_51] : memref<128x128xf32, #tpu.memory_space<vmem>>, vector<128x128xf32>
    %cst_52 = arith.constant dense<0.000000e+00> : vector<16x128xf32>
    %81 = tpu.matmul %79, %80, %cst_52 {dimension_numbers = #tpu.dot_dimension_numbers<[1], [0], [0], [1], [0, 0, 1, 1], [], []>} : vector<16x128xf32>, vector<128x128xf32>, vector<16x128xf32> -> vector<16x128xf32>
    %c0_53 = arith.constant 0 : index
    %c0_54 = arith.constant 0 : index
    %82 = vector.load %arg6[%c0_53, %c0_54] : memref<1x128xf32, #tpu.memory_space<vmem>>, vector<1x128xf32>
    %83 = vector.broadcast %82 : vector<1x128xf32> to vector<16x128xf32>
    %84 = arith.addf %81, %83 : vector<16x128xf32>
    %c0_55 = arith.constant 0 : index
    %c0_56 = arith.constant 0 : index
    %85 = vector.load %arg7[%c0_55, %c0_56] : memref<16x128xf32, #tpu.memory_space<vmem>>, vector<16x128xf32>
    tpu.vector_store %arg7[%c0_55, %c0_56], %84 {strides = array<i32>} : memref<16x128xf32, #tpu.memory_space<vmem>>, vector<16x128xf32>,
    return
  }
  func.func @transform_0(%arg0: i32) -> (i32, i32) {
    %c0_i32 = arith.constant 0 : i32
    %c0_i32_0 = arith.constant 0 : i32
    %c0_i32_1 = arith.constant 0 : i32
    return %c0_i32, %c0_i32_0 : i32, i32
  }
  func.func @transform_1(%arg0: i32) -> (i32, i32) {
    %c0_i32 = arith.constant 0 : i32
    %c0_i32_0 = arith.constant 0 : i32
    %c0_i32_1 = arith.constant 0 : i32
    return %c0_i32, %c0_i32_0 : i32, i32
  }
  func.func @transform_2(%arg0: i32) -> (i32, i32) {
    %c0_i32 = arith.constant 0 : i32
    %c0_i32_0 = arith.constant 0 : i32
    %c0_i32_1 = arith.constant 0 : i32
    return %c0_i32, %c0_i32_0 : i32, i32
  }
  func.func @transform_3(%arg0: i32) -> (i32, i32) {
    %c0_i32 = arith.constant 0 : i32
    %c0_i32_0 = arith.constant 0 : i32
    %c0_i32_1 = arith.constant 0 : i32
    return %c0_i32, %c0_i32_0 : i32, i32
  }
  func.func @transform_4(%arg0: i32) -> (i32, i32) {
    %c0_i32 = arith.constant 0 : i32
    %c0_i32_0 = arith.constant 0 : i32
    %c0_i32_1 = arith.constant 0 : i32
    return %c0_i32, %c0_i32_0 : i32, i32
  }
  func.func @transform_5(%arg0: i32) -> (i32, i32) {
    %c0_i32 = arith.constant 0 : i32
    %c0_i32_0 = arith.constant 0 : i32
    %c0_i32_1 = arith.constant 0 : i32
    return %c0_i32, %c0_i32_0 : i32, i32
  }
  func.func @transform_6(%arg0: i32) -> (i32, i32) {
    %c0_i32 = arith.constant 0 : i32
    %c0_i32_0 = arith.constant 0 : i32
    %c0_i32_1 = arith.constant 0 : i32
    return %c0_i32, %c0_i32_0 : i32, i32
  }
}

</mosaic_0001>

<bundles_post_ra>
// kernel: tpu_custom_call.1
= control target key start
LH: loop header
LB: loop body
LE: loop exit
PB: predicated region body
PF: predicated region fallthrough
CT: control target
= control target key end

     0   :  { %11 = vsyncpa [#allocation7], 0  ;;  %s1340_s0 = inlined_call_operand.hbm [shape: f32[16,32], index: 0, kind: input, shape index: {}]   ;;  %s1341_s1 = inlined_call_operand.hbm [shape: f32[32,512], index: 1, kind: input, shape index: {}]   ;;  %s1342_s2 = inlined_call_operand.hbm [shape: f32[128,512], index: 2, kind: input, shape index: {}]   ;;  %s1343_s3 = inlined_call_operand.hbm [shape: f32[1,512], index: 3, kind: input, shape index: {}]   ;;  %s1344_s4 = inlined_call_operand.hbm [shape: f32[128,128], index: 4, kind: input, shape index: {}]   ;;  %s1345_s5 = inlined_call_operand.vmem [shape: f32[1,128], index: 5, kind: input, shape index: {}]   ;;  %s1346_s6 = inlined_call_operand.hbm [shape: f32[16,128], index: 6, kind: output, shape index: {}]  }
   0x1   :  { %12 = vsyncpa [#allocation10], 0 }
   0x2   :  { %13 = vsyncpa [#allocation13], 0  ;;  %s32_s23 = sshll.u32 %s1341_s1, 4  ;;  %s33_s23 = int_to_ptr.hbm [resolvable:$true] %s32_s23 }
   0x3   :  { %14 = vsyncpa [#allocation8], 0  ;;  %s955_s24 = smov [#allocation9]   ;;  %s59_s28 = sshll.u32 %s1343_s3, 4  ;;  %s60_s28 = int_to_ptr.hbm [resolvable:$true] %s59_s28 }
   0x4   :  { %s34_s25 = sshll.u32 %s955_s24, 4  ;;  %s956_s29 = smov 512   ;;  %s35_s25 = int_to_ptr.vmem [resolvable:$true] %s34_s25 }
   0x5   :  { %s957_s30 = smov 32   ;;  %s958_s7 = smov [#allocation12]  }
   0x6   :  { %40 = dma.hbm_to_vmem [thread:$0]  %s33_s23, 2048, %s35_s25, [#allocation10], %s956_s29, %s956_s29, %s957_s30  }
   0x7   :  { %s61_s8 = sshll.u32 %s958_s7, 4  ;;  %s19_s11 = sshll.u32 %s1340_s0, 4  ;;  %s62_s8 = int_to_ptr.vmem [resolvable:$true] %s61_s8  ;;  %s20_s11 = int_to_ptr.hbm [resolvable:$true] %s19_s11 }
   0x8   :  { %64 = dma.hbm_to_vmem [thread:$0]  %s60_s28, 64, %s62_s8, [#allocation13]  }
   0x9   :  { %s959_s1 = smov [#allocation6]   ;;  %s45_s3 = sshll.u32 %s1342_s2, 4  ;;  %s46_s3 = int_to_ptr.hbm [resolvable:$true] %s45_s3 }
   0xa   :  { %s21_s12 = sshll.u32 %s959_s1, 4  ;;  %s960_s15 = smov 128   ;;  %s22_s12 = int_to_ptr.vmem [resolvable:$true] %s21_s12 }
   0xb   :  { %s961_s16 = smov 8   ;;  %s962_s17 = smov [#allocation11]  }
   0xc   :  { %27 = dma.hbm_to_vmem [thread:$0]  %s20_s11, 256, %s22_s12, [#allocation7], %s960_s15, %s960_s15, %s961_s16  }
   0xd   :  { %s47_s18 = sshll.u32 %s962_s17, 4  ;;  %s69_s20 = sshll.u32 %s1344_s4, 4  ;;  %s48_s18 = int_to_ptr.vmem [resolvable:$true] %s47_s18  ;;  %s70_s20 = int_to_ptr.hbm [resolvable:$true] %s69_s20 }
   0xe   :  { %53 = dma.hbm_to_vmem [thread:$0]  %s46_s3, 8192, %s48_s18, [#allocation10], %s956_s29, %s956_s29, %s957_s30  }
   0xf   :  { %s963_s21 = smov [#allocation14]  }
  0x10   :  { %s71_s22 = sshll.u32 %s963_s21, 4  ;;  %s72_s22 = int_to_ptr.vmem [resolvable:$true] %s71_s22 }
  0x11   :  { %77 = dma.hbm_to_vmem [thread:$0]  %s70_s20, 2048, %s72_s22, [#allocation13], %s960_s15, %s960_s15, %s961_s16  }
  0x12   :  { %947 = dma.done.wait [#allocation7], 256  }
  0x13   :  { %948 = vsyncadd [#allocation7], 4294967040 }
  0x14   :  { %949 = dma.done.wait [#allocation10], 10240  }
  0x15   :  { %950 = vsyncadd [#allocation10], 4294957056 }
  0x16   :  { %951 = dma.done.wait [#allocation13], 2112  }
  0x17   :  { %952 = vsyncadd [#allocation13], 4294965184  ;;  %v114_v0 = vld [vmem:[#allocation9 + $0x60] sm:$0xff]  ;;  %v117_v1 = vld [vmem:[#allocation9 + $0x78] sm:$0xff]  ;;  %vm128_vm0 = vcmask 261120   ;;  %s730_s26 = sshll.u32 %s1346_s6, 4  ;;  %s731_s26 = int_to_ptr.hbm [resolvable:$true] %s730_s26 }
  0x18   :  { %v1022_v2 = vld [vmem:[#allocation11 + $0x1e0] sm:$0xff]  ;;  %147 = vmatpush.msra.mxu1 %v114_v0  ;;  %216 = vmatpush.msra.mxu3 %v117_v1  ;;  %v113_v4 = vld [vmem:[#allocation9 + $0x58] sm:$0xff]  ;;  %v116_v11 = vld [vmem:[#allocation9 + $0x70] sm:$0xff] }
  0x19   :  { %v110_v3 = vld [vmem:[#allocation9 + $0x40] sm:$0xff]  ;;  %306 = vmatpush.msra.mxu0 %v1022_v2  ;;  %v109_v7 = vld [vmem:[#allocation9 + $0x38] sm:$0xff]  ;;  %v115_v13 = vld [vmem:[#allocation9 + $0x68] sm:$0xff]  ;;  %193 = vmatpush.msra.mxu2 %v116_v11 }
  0x1a   :  { %v1024_v5 = vld [vmem:[#allocation11 + $0x1c0] sm:$0xff]  ;;  %148 = vmatpush.msra.mxu1 %v110_v3  ;;  %217 = vmatpush.msra.mxu3 %v113_v4  ;;  %v105_v10 = vld [vmem:[#allocation9 + $0x18] sm:$0xff]  ;;  %v112_v15 = vld [vmem:[#allocation9 + $0x50] sm:$0xff]  ;;  %v964_v3 = vmov 0.0  }
  0x1b   :  { %v106_v6 = vld [vmem:[#allocation9 + $0x20] sm:$0xff]  ;;  %307 = vmatpush.msra.mxu0 %v1024_v5  ;;  %v1033_v14 = vld [vmem:[#allocation11 + $0x1f8] sm:$0xff]  ;;  %v111_v17 = vld [vmem:[#allocation9 + $0x48] sm:$0xff]  ;;  %194 = vmatpush.msra.mxu2 %v112_v15 }
  0x1c   :  { %v1027_v8 = vld [vmem:[#allocation11 + $0x1a0] sm:$0xff]  ;;  %149 = vmatpush.msra.mxu1 %v106_v6  ;;  %218 = vmatpush.msra.mxu3 %v109_v7  ;;  %v1038_v18 = vld [vmem:[#allocation11 + $0x1d8] sm:$0xff]  ;;  %v108_v19 = vld [vmem:[#allocation9 + $0x30] sm:$0xff] }
  0x1d   :  { %v102_v9 = vld [vmem:[#allocation9] sm:$0xff]  ;;  %308 = vmatpush.msra.mxu0 %v1027_v8  ;;  %v107_v21 = vld [vmem:[#allocation9 + $0x28] sm:$0xff]  ;;  %v1044_v22 = vld [vmem:[#allocation11 + $0x1b8] sm:$0xff]  ;;  %195 = vmatpush.msra.mxu2 %v108_v19 }
  0x1e   :  { %v1030_v12 = vld [vmem:[#allocation11 + $0x180] sm:$0xff]  ;;  %150 = vmatpush.msra.mxu1 %v102_v9  ;;  %219 = vmatpush.msra.mxu3 %v105_v10  ;;  %v1046_v23 = vld [vmem:[#allocation6] sm:$0xff]  ;;  %v103_v25 = vld [vmem:[#allocation9 + $0x8] sm:$0xff] }
  0x1f   :  { %v1035_v16 = vld [vmem:[#allocation11 + $0x160] sm:$0xff]  ;;  %309 = vmatpush.msra.mxu0 %v1030_v12  ;;  %v1052_v26 = vld [vmem:[#allocation11 + $0x198] sm:$0xff]  ;;  %v104_v27 = vld [vmem:[#allocation9 + $0x10] sm:$0xff]  ;;  %745 = vmatmul.msk.f32.vlgmr.msra.gmra.mxu1 %vm128_vm0, %v1046_v23 }
  0x20   :  { %170 = vmatpush.msrb.mxu1 %v115_v13  ;;  %366 = vmatpush.msrb.mxu3 %v1033_v14  ;;  %v1041_v20 = vld [vmem:[#allocation11 + $0x140] sm:$0xff]  ;;  %v1059_v29 = vld [vmem:[#allocation11 + $0x1e8] sm:$0xff]  ;;  %v1062_v30 = vld [vmem:[#allocation11 + $0x1f0] sm:$0xff] }
  0x21   :  { %310 = vmatpush.msra.mxu0 %v1035_v16  ;;  %v1049_v24 = vld [vmem:[#allocation11 + $0x120] sm:$0xff]  ;;  %v1064_v31 = vld [vmem:[#allocation11 + $0x178] sm:$0xff]  ;;  %196 = vmatpush.msra.mxu2 %v104_v27  ;;  %v1069_v33 = vld [vmem:[#allocation11 + $0x1c8] sm:$0xff] }
  0x22   :  { %171 = vmatpush.msrb.mxu1 %v111_v17  ;;  %367 = vmatpush.msrb.mxu3 %v1038_v18  ;;  %v1057_v28 = vld [vmem:[#allocation11 + $0x100] sm:$0xff]  ;;  %v1073_v34 = vld [vmem:[#allocation11 + $0x1d0] sm:$0xff]  ;;  %v1075_v35 = vld [vmem:[#allocation11 + $0x158] sm:$0xff] }
  0x23   :  { %311 = vmatpush.msra.mxu0 %v1041_v20  ;;  %v1067_v32 = vld [vmem:[#allocation11 + $0xe0] sm:$0xff]  ;;  %346 = vmatpush.msrb.mxu2 %v1062_v30  ;;  %v1081_v37 = vld [vmem:[#allocation11 + $0x1a8] sm:$0xff]  ;;  %v1085_v38 = vld [vmem:[#allocation11 + $0x1b0] sm:$0xff] }
  0x24   :  { %172 = vmatpush.msrb.mxu1 %v107_v21  ;;  %368 = vmatpush.msrb.mxu3 %v1044_v22  ;;  %v1079_v36 = vld [vmem:[#allocation11 + $0xc0] sm:$0xff]  ;;  %v1087_v39 = vld [vmem:[#allocation11 + $0x138] sm:$0xff]  ;;  %v1093_v41 = vld [vmem:[#allocation11 + $0x188] sm:$0xff] }
  0x25   :  { %312 = vmatpush.msra.mxu0 %v1049_v24  ;;  %347 = vmatpush.msrb.mxu2 %v1073_v34  ;;  %v1091_v40 = vld [vmem:[#allocation11 + $0xa0] sm:$0xff]  ;;  %v1097_v42 = vld [vmem:[#allocation6 + $0x8] sm:$0xff]  ;;  %v1099_v43 = vld [vmem:[#allocation11 + $0x190] sm:$0xff] }
  0x26   :  { %173 = vmatpush.msrb.mxu1 %v103_v25  ;;  %369 = vmatpush.msrb.mxu3 %v1052_v26  ;;  %v1103_v44 = vld [vmem:[#allocation11 + $0x118] sm:$0xff]  ;;  %v1105_v45 = vld [vmem:[#allocation11 + $0x80] sm:$0xff]  ;;  %v1109_v46 = vld [vmem:[#allocation11 + $0x168] sm:$0xff] }
  0x27   :  { %313 = vmatpush.msra.mxu0 %v1057_v28  ;;  %348 = vmatpush.msrb.mxu2 %v1085_v38  ;;  %v1114_v47 = vld [vmem:[#allocation11 + $0x170] sm:$0xff]  ;;  %v1116_v48 = vld [vmem:[#allocation11 + $0xf8] sm:$0xff]  ;;  %v1120_v49 = vld [vmem:[#allocation11 + $0x60] sm:$0xff] }
  0x28   :  { %326 = vmatpush.msra.mxu1 %v1059_v29  ;;  %370 = vmatpush.msrb.mxu3 %v1064_v31  ;;  %v1122_v50 = vld [vmem:[#allocation11 + $0x148] sm:$0xff]  ;;  %v1127_v51 = vld [vmem:[#allocation11 + $0x150] sm:$0xff]  ;;  %v1129_v52 = vld [vmem:[#allocation11 + $0xd8] sm:$0xff] }
  0x29   :  { %314 = vmatpush.msra.mxu0 %v1067_v32  ;;  %746 = vmatmul.msk.f32.gmra.mxu1 %vm128_vm0, %v1097_v42  ;;  %v1133_v53 = vld [vmem:[#allocation11 + $0x40] sm:$0xff]  ;;  %v1135_v54 = vld [vmem:[#allocation11 + $0x128] sm:$0xff]  ;;  %v1139_v55 = vld [vmem:[#allocation11 + $0x130] sm:$0xff] }
  0x2a   :  { %327 = vmatpush.msra.mxu1 %v1069_v33  ;;  %371 = vmatpush.msrb.mxu3 %v1075_v35  ;;  %v1141_v56 = vld [vmem:[#allocation11 + $0xb8] sm:$0xff]  ;;  %v1145_v57 = vld [vmem:[#allocation11 + $0x20] sm:$0xff]  ;;  %v1147_v58 = vld [vmem:[#allocation11 + $0x108] sm:$0xff] }
  0x2b   :  { %315 = vmatpush.msra.mxu0 %v1079_v36  ;;  %349 = vmatpush.msrb.mxu2 %v1099_v43  ;;  %v1151_v59 = vld [vmem:[#allocation11 + $0x110] sm:$0xff]  ;;  %v1155_v60 = vld [vmem:[#allocation11 + $0x98] sm:$0xff]  ;;  %v1159_v61 = vld [vmem:[#allocation11] sm:$0xff] }
  0x2c   :  { %328 = vmatpush.msra.mxu1 %v1081_v37  ;;  %372 = vmatpush.msrb.mxu3 %v1087_v39  ;;  %v1164_v62 = vld [vmem:[#allocation11 + $0xe8] sm:$0xff]  ;;  %v1169_v63 = vld [vmem:[#allocation11 + $0xf0] sm:$0xff]  ;;  %v1171_v0 = vld [vmem:[#allocation11 + $0x78] sm:$0xff] }
  0x2d   :  { %316 = vmatpush.msra.mxu0 %v1091_v40  ;;  %751 = vmatmul.msk.f32.vlgmr.msra.gmra.mxu3 %vm128_vm0, %v1046_v23  ;;  %v1176_v1 = vld [vmem:[#allocation11 + $0xc8] sm:$0xff]  ;;  %v1179_v4 = vld [vmem:[#allocation11 + $0xd0] sm:$0xff]  ;;  %v1181_v6 = vld [vmem:[#allocation11 + $0x58] sm:$0xff] }
  0x2e   :  { %329 = vmatpush.msra.mxu1 %v1093_v41  ;;  %373 = vmatpush.msrb.mxu3 %v1103_v44  ;;  %v1185_v7 = vld [vmem:[#allocation11 + $0xa8] sm:$0xff]  ;;  %v1188_v9 = vld [vmem:[#allocation11 + $0xb0] sm:$0xff]  ;;  %v1190_v10 = vld [vmem:[#allocation11 + $0x38] sm:$0xff] }
  0x2f   :  { %317 = vmatpush.msra.mxu0 %v1105_v45  ;;  %350 = vmatpush.msrb.mxu2 %v1114_v47  ;;  %v1195_v11 = vld [vmem:[#allocation11 + $0x88] sm:$0xff]  ;;  %v1198_v13 = vld [vmem:[#allocation11 + $0x90] sm:$0xff]  ;;  %v1203_v15 = vld [vmem:[#allocation11 + $0x18] sm:$0xff] }
  0x30   :  { %330 = vmatpush.msra.mxu1 %v1109_v46  ;;  %374 = vmatpush.msrb.mxu3 %v1116_v48  ;;  %v1205_v17 = vld [vmem:[#allocation11 + $0x68] sm:$0xff]  ;;  %v1219_v19 = vld [vmem:[#allocation11 + $0x50] sm:$0xff] }
  0x31   :  { %318 = vmatpush.msra.mxu0 %v1120_v49  ;;  %351 = vmatpush.msrb.mxu2 %v1127_v51  ;;  %v1222_v21 = vld [vmem:[#allocation11 + $0x28] sm:$0xff]  ;;  %v1233_v27 = vld [vmem:[#allocation11 + $0x10] sm:$0xff] }
  0x32   :  { %331 = vmatpush.msra.mxu1 %v1122_v50  ;;  %375 = vmatpush.msrb.mxu3 %v1129_v52  ;;  %v1229_v25 = vld [vmem:[#allocation11 + $0x8] sm:$0xff] }
  0x33   :  { %319 = vmatpush.msra.mxu0 %v1133_v53  ;;  %352 = vmatpush.msrb.mxu2 %v1139_v55 }
  0x34   :  { %332 = vmatpush.msra.mxu1 %v1135_v54  ;;  %376 = vmatpush.msrb.mxu3 %v1141_v56 }
  0x35   :  { %320 = vmatpush.msra.mxu0 %v1145_v57  ;;  %747 = vmatmul.msk.f32.vlgmr.msrb.gmra.mxu1 %vm128_vm0, %v1046_v23 }
  0x36   :  { %333 = vmatpush.msra.mxu1 %v1147_v58  ;;  %353 = vmatpush.msrb.mxu2 %v1151_v59 }
  0x37   :  { %377 = vmatpush.msrb.mxu3 %v1155_v60  ;;  %749 = vmatmul.msk.f32.vlgmr.msra.gmra.mxu2 %vm128_vm0, %v1046_v23  ;;  %v1225_v23 = vld [vmem:[#allocation11 + $0x30] sm:$0xff] }
  0x38   :  { %752 = vmatmul.msk.f32.gmra.mxu3 %vm128_vm0, %v1097_v42  ;;  %321 = vmatpush.msra.mxu0 %v1159_v61 }
  0x39   :  { %334 = vmatpush.msra.mxu1 %v1164_v62  ;;  %322 = vmatmul.f32.vlgmr.msra.gmra.mxu0 %v964_v3 }
  0x3a   :  { %354 = vmatpush.msrb.mxu2 %v1169_v63  ;;  %378 = vmatpush.msrb.mxu3 %v1171_v0 }
  0x3b   :  { %335 = vmatpush.msra.mxu1 %v1176_v1  ;;  %526 = vmatpush.msrb.mxu0 %v1022_v2  ;;  %v1210_v2 = vld [vmem:[#allocation11 + $0x70] sm:$0xff] }
  0x3c   :  { %355 = vmatpush.msrb.mxu2 %v1179_v4  ;;  %379 = vmatpush.msrb.mxu3 %v1181_v6 }
  0x3d   :  { %336 = vmatpush.msra.mxu1 %v1185_v7  ;;  %527 = vmatpush.msrb.mxu0 %v1024_v5  ;;  %v1215_v5 = vld [vmem:[#allocation11 + $0x48] sm:$0xff] }
  0x3e   :  { %356 = vmatpush.msrb.mxu2 %v1188_v9  ;;  %380 = vmatpush.msrb.mxu3 %v1190_v10 }
  0x3f   :  { %337 = vmatpush.msra.mxu1 %v1195_v11  ;;  %750 = vmatmul.msk.f32.gmra.mxu2 %vm128_vm0, %v1097_v42 }
  0x40   :  { %748 = vmatmul.msk.f32.gmra.mxu1 %vm128_vm0, %v1097_v42  ;;  %357 = vmatpush.msrb.mxu2 %v1198_v13  ;;  %v691_v42 = vld [vmem:[#allocation14 + $0x60] sm:$0xff] }
  0x41   :  { %381 = vmatpush.msrb.mxu3 %v1203_v15  ;;  %338 = vmatpush.msra.mxu1 %v1205_v17 }
  0x42   :  { %382 = vmatmul.f32.vlgmr.msrb.gmra.mxu3 %v964_v3  ;;  %358 = vmatpush.msrb.mxu2 %v1210_v2 }
  0x43   :  { %339 = vmatpush.msra.mxu1 %v1215_v5  ;;  %528 = vmatpush.msrb.mxu0 %v1027_v8 }
  0x44   :  { %359 = vmatpush.msrb.mxu2 %v1219_v19  ;;  %586 = vmatpush.msra.mxu3 %v1033_v14 }
  0x45   :  { %340 = vmatpush.msra.mxu1 %v1222_v21  ;;  %529 = vmatpush.msrb.mxu0 %v1030_v12  ;;  %v1298_v12 = vld [vmem:[#allocation12] sm:$0xf] }
  0x46   :  { %360 = vmatpush.msrb.mxu2 %v1225_v23  ;;  %587 = vmatpush.msra.mxu3 %v1038_v18  ;;  %v120_v14 = vperm.slane %v1298_v12, 0 }
  0x47   :  { %341 = vmatpush.msra.mxu1 %v1229_v25  ;;  %530 = vmatpush.msrb.mxu0 %v1035_v16 }
  0x48   :  { %342 = vmatmul.f32.vlgmr.msra.gmra.mxu1 %v964_v3  ;;  %361 = vmatpush.msrb.mxu2 %v1233_v27 }
  0x49   :  { %362 = vmatmul.f32.vlgmr.msrb.gmra.mxu2 %v964_v3  ;;  %531 = vmatpush.msrb.mxu0 %v1041_v20 }
  0x4a   :  { %546 = vmatpush.msrb.mxu1 %v1059_v29  ;;  %566 = vmatpush.msra.mxu2 %v1062_v30  ;;  %v123_v30 = vperm.slane %v1298_v12, 3 }
  0x4b   :  { %532 = vmatpush.msrb.mxu0 %v1049_v24  ;;  %588 = vmatpush.msra.mxu3 %v1044_v22 }
  0x4c   :  { %547 = vmatpush.msrb.mxu1 %v1069_v33  ;;  %567 = vmatpush.msra.mxu2 %v1073_v34  ;;  %v694_v33 = vld [vmem:[#allocation14 + $0x78] sm:$0xff]  ;;  %v121_v34 = vperm.slane %v1298_v12, 1 }
  0x4d   :  { %533 = vmatpush.msrb.mxu0 %v1057_v28  ;;  %589 = vmatpush.msra.mxu3 %v1052_v26 }
  0x4e   :  { %548 = vmatpush.msrb.mxu1 %v1081_v37  ;;  %568 = vmatpush.msra.mxu2 %v1085_v38  ;;  %v693_v37 = vld [vmem:[#allocation14 + $0x70] sm:$0xff] }
  0x4f   :  { %534 = vmatpush.msrb.mxu0 %v1067_v32  ;;  %590 = vmatpush.msra.mxu3 %v1064_v31 }
  0x50   :  { %549 = vmatpush.msrb.mxu1 %v1093_v41  ;;  %569 = vmatpush.msra.mxu2 %v1099_v43  ;;  %v122_v41 = vperm.slane %v1298_v12, 2 }
  0x51   :  { %535 = vmatpush.msrb.mxu0 %v1079_v36  ;;  %591 = vmatpush.msra.mxu3 %v1075_v35 }
  0x52   :  { %550 = vmatpush.msrb.mxu1 %v1109_v46  ;;  %570 = vmatpush.msra.mxu2 %v1114_v47  ;;  %v690_v46 = vld [vmem:[#allocation14 + $0x58] sm:$0xff] }
  0x53   :  { %536 = vmatpush.msrb.mxu0 %v1091_v40  ;;  %592 = vmatpush.msra.mxu3 %v1087_v39  ;;  %v692_v39 = vld [vmem:[#allocation14 + $0x68] sm:$0xff] }
  0x54   :  { %551 = vmatpush.msrb.mxu1 %v1122_v50  ;;  %571 = vmatpush.msra.mxu2 %v1127_v51  ;;  %v689_v51 = vld [vmem:[#allocation14 + $0x50] sm:$0xff] }
  0x55   :  { %537 = vmatpush.msrb.mxu0 %v1105_v45  ;;  %593 = vmatpush.msra.mxu3 %v1103_v44 }
  0x56   :  { %552 = vmatpush.msrb.mxu1 %v1135_v54  ;;  %572 = vmatpush.msra.mxu2 %v1139_v55  ;;  %v688_v54 = vld [vmem:[#allocation14 + $0x48] sm:$0xff] }
  0x57   :  { %538 = vmatpush.msrb.mxu0 %v1120_v49  ;;  %594 = vmatpush.msra.mxu3 %v1116_v48 }
  0x58   :  { %553 = vmatpush.msrb.mxu1 %v1147_v58  ;;  %573 = vmatpush.msra.mxu2 %v1151_v59  ;;  %v686_v58 = vld [vmem:[#allocation14 + $0x38] sm:$0xff]  ;;  %v685_v59 = vld [vmem:[#allocation14 + $0x30] sm:$0xff] }
  0x59   :  { %539 = vmatpush.msrb.mxu0 %v1133_v53  ;;  %595 = vmatpush.msra.mxu3 %v1129_v52 }
  0x5a   :  { %554 = vmatpush.msrb.mxu1 %v1164_v62  ;;  %574 = vmatpush.msra.mxu2 %v1169_v63  ;;  %v683_v63 = vld [vmem:[#allocation14 + $0x20] sm:$0xff] }
  0x5b   :  { %540 = vmatpush.msrb.mxu0 %v1145_v57  ;;  %596 = vmatpush.msra.mxu3 %v1141_v56  ;;  %v687_v57 = vld [vmem:[#allocation14 + $0x40] sm:$0xff] }
  0x5c   :  { %555 = vmatpush.msrb.mxu1 %v1176_v1  ;;  %575 = vmatpush.msra.mxu2 %v1179_v4 }
  0x5d   :  { %541 = vmatpush.msrb.mxu0 %v1159_v61  ;;  %597 = vmatpush.msra.mxu3 %v1155_v60  ;;  %v684_v61 = vld [vmem:[#allocation14 + $0x28] sm:$0xff] }
  0x5e   :  { %556 = vmatpush.msrb.mxu1 %v1185_v7  ;;  %576 = vmatpush.msra.mxu2 %v1188_v9  ;;  %v682_v7 = vld [vmem:[#allocation14 + $0x18] sm:$0xff]  ;;  %v681_v9 = vld [vmem:[#allocation14 + $0x10] sm:$0xff] }
  0x5f   :  { %598 = vmatpush.msra.mxu3 %v1171_v0  ;;  %699 = vmatpush.msra.mxu0 %v694_v33 }
  0x60   :  { %557 = vmatpush.msrb.mxu1 %v1195_v11  ;;  %577 = vmatpush.msra.mxu2 %v1198_v13  ;;  %v680_v13 = vld [vmem:[#allocation14 + $0x8] sm:$0xff] }
  0x61   :  { %599 = vmatpush.msra.mxu3 %v1181_v6  ;;  %700 = vmatpush.msra.mxu0 %v693_v37 }
  0x62   :  { %558 = vmatpush.msrb.mxu1 %v1205_v17  ;;  %578 = vmatpush.msra.mxu2 %v1210_v2  ;;  %v679_v17 = vld [vmem:[#allocation14] sm:$0xff] }
  0x63   :  { %600 = vmatpush.msra.mxu3 %v1190_v10  ;;  %701 = vmatpush.msra.mxu0 %v692_v39 }
  0x64   :  { %559 = vmatpush.msrb.mxu1 %v1215_v5  ;;  %579 = vmatpush.msra.mxu2 %v1219_v19 }
  0x65   :  { %601 = vmatpush.msra.mxu3 %v1203_v15  ;;  %702 = vmatpush.msra.mxu0 %v691_v42 }
  0x66   :  { %560 = vmatpush.msrb.mxu1 %v1222_v21  ;;  %580 = vmatpush.msra.mxu2 %v1225_v23 }
  0x67   :  { %703 = vmatpush.msra.mxu0 %v690_v46 }
  0x68   :  { %561 = vmatpush.msrb.mxu1 %v1229_v25  ;;  %581 = vmatpush.msra.mxu2 %v1233_v27 }
  0x69   :  { %704 = vmatpush.msra.mxu0 %v689_v51 }
  0x6b   :  { %705 = vmatpush.msra.mxu0 %v688_v54 }
  0x6d   :  { %706 = vmatpush.msra.mxu0 %v687_v57 }
  0x6f   :  { %707 = vmatpush.msra.mxu0 %v686_v58 }
  0x71   :  { %708 = vmatpush.msra.mxu0 %v685_v59 }
  0x73   :  { %709 = vmatpush.msra.mxu0 %v684_v61 }
  0x75   :  { %710 = vmatpush.msra.mxu0 %v683_v63 }
  0x77   :  { %711 = vmatpush.msra.mxu0 %v682_v7 }
  0x79   :  { %712 = vmatpush.msra.mxu0 %v681_v9 }
  0x7b   :  { %713 = vmatpush.msra.mxu0 %v680_v13 }
  0x7d   :  { %714 = vmatpush.msra.mxu0 %v679_v17 }
  0x9c   :  { %v152_v8 = vpop.f32.mrf.mxu1 }
  0x9d   :  { %v153_v24 = vadd.f32 %v152_v8, %v120_v14 }
  0xa6   :  { %v155_v16 = vpop.f32.mrf.mxu1 }
  0xa7   :  { %v1301_v18 = vadd.f32 %v155_v16, %v120_v14 }
  0xb0   :  { %v221_v20 = vpop.f32.mrf.mxu3 }
  0xb1   :  { %v222_v47 = vadd.f32 %v221_v20, %v123_v30 }
  0xb2   :  { %v175_v22 = vpop.f32.mrf.mxu1 }
  0xb3   :  { %v176_v48 = vadd.f32 %v175_v22, %v121_v34 }
  0xb6   :  { %v323_v26 = vpop.f32.mrf.mxu0 }
  0xb7   :  { %v386_v28 = vadd.f32 %v323_v26, %v153_v24 }
  0xb9   :  { %v753_v29 = vmul.f32 -1.442695, %v386_v28 }
  0xba   :  { %v198_v31 = vpop.f32.mrf.mxu2 }
  0xbb   :  { %771 = vpow2.f32 %v753_v29  ;;  %v224_v32 = vpop.f32.mrf.mxu3  ;;  %v199_v10 = vadd.f32 %v198_v31, %v122_v41 }
  0xbc   :  { %v1305_v35 = vadd.f32 %v224_v32, %v123_v30 }
  0xbd   :  { %v178_v36 = vpop.f32.mrf.mxu1 }
  0xbe   :  { %v1307_v38 = vadd.f32 %v178_v36, %v121_v34 }
  0xc1   :  { %v772_v40 = vpop.eup %771 }
  0xc2   :  { %v1310_v43 = vadd.f32 1.0, %v772_v40  ;;  %v201_v44 = vpop.f32.mrf.mxu2 }
  0xc3   :  { %v1312_v45 = vadd.f32 %v201_v44, %v122_v41 }
  0xc4   :  { %773 = vrcp.f32 %v1310_v43  ;;  %v405_v27 = vand.u32 2147483648, %v1310_v43  ;;  %vm399_vm2 = vweird.f32 %v1310_v43  ;;  %v403_v12 = vand.u32 2147483647, %v1310_v43 }
  0xc5   :  { %v383_v49 = vpop.f32.mrf.mxu3  ;;  %v343_v50 = vpop.f32.mrf.mxu1 }
  0xc6   :  { %v389_v52 = vadd.f32 %v383_v49, %v222_v47  ;;  %v387_v53 = vadd.f32 %v343_v50, %v176_v48  ;;  %v406_v26 = vor.u32 1.1754944e-38, %v405_v27  ;;  %vm404_vm6 = vcmp.eq.f32.partialorder %v403_v12, 8.507059e+37 }
  0xc8   :  { %v755_v55 = vmul.f32 -1.442695, %v389_v52  ;;  %v754_v56 = vmul.f32 -1.442695, %v387_v53 }
  0xca   :  { %775 = vpow2.f32 %v755_v55  ;;  %v774_v60 = vpop.eup %773  ;;  %v1327_v55 = vld [vmem:[%s1345_s5] ss:$0 sm:$0xff]  ;;  %s965_s5 = smov [#allocation15]  }
  0xcb   :  { %777 = vpow2.f32 %v754_v56  ;;  %v395_v62 = vmul.f32 %v774_v60, %v1310_v43  ;;  %vm400_vm1 = vweird.f32 %v774_v60  ;;  %s728_s23 = sshll.u32 %s965_s5, 4  ;;  %s729_s23 = int_to_ptr.vmem [resolvable:$true] %s728_s23 }
  0xcc   :  { %v363_v11 = vpop.f32.mrf.mxu2  ;;  %vm401_vm3 = vmor %vm399_vm2, %vm400_vm1 }
  0xcd   :  { %v396_v6 = vsub.f32 1.0, %v395_v62  ;;  %v388_v2 = vadd.f32 %v363_v11, %v199_v10 }
  0xcf   :  { %v397_v15 = vmul.f32 %v774_v60, %v396_v6 }
  0xd0   :  { %v776_v0 = vpop.eup %775 }
  0xd1   :  { %v778_v1 = vpop.eup %777  ;;  %v432_v3 = vadd.f32 1.0, %v776_v0  ;;  %v398_v23 = vadd.f32 %v774_v60, %v397_v15 }
  0xd2   :  { %v412_v4 = vadd.f32 1.0, %v778_v1 }
  0xd3   :  { %779 = vrcp.f32 %v432_v3  ;;  %v402_v20 = vsel %vm401_vm3, %v774_v60, %v398_v23  ;;  %v444_v41 = vand.u32 2147483648, %v432_v3  ;;  %vm438_vm10 = vweird.f32 %v432_v3 }
  0xd4   :  { %781 = vrcp.f32 %v412_v4  ;;  %v424_v14 = vand.u32 2147483648, %v412_v4  ;;  %v422_v22 = vand.u32 2147483647, %v412_v4  ;;  %vm418_vm5 = vweird.f32 %v412_v4 }
  0xd5   :  { %783 = vtanh.f32 %v388_v2  ;;  %v407_v31 = vsel %vm404_vm6, %v406_v26, %v402_v20  ;;  %v442_v42 = vand.u32 2147483647, %v432_v3  ;;  %v445_v44 = vor.u32 1.1754944e-38, %v444_v41 }
  0xd6   :  { %v425_v30 = vor.u32 1.1754944e-38, %v424_v14  ;;  %vm423_vm8 = vcmp.eq.f32.partialorder %v422_v22, 8.507059e+37 }
  0xd7   :  { %vm443_vm12 = vcmp.eq.f32.partialorder %v442_v42, 8.507059e+37 }
  0xd9   :  { %v780_v5 = vpop.eup %779 }
  0xda   :  { %v782_v19 = vpop.eup %781  ;;  %v434_v25 = vmul.f32 %v780_v5, %v432_v3  ;;  %vm439_vm9 = vweird.f32 %v780_v5 }
  0xdb   :  { %v414_v21 = vmul.f32 %v782_v19, %v412_v4  ;;  %vm419_vm4 = vweird.f32 %v782_v19  ;;  %v784_v29 = vpop.eup %783  ;;  %vm440_vm11 = vmor %vm438_vm10, %vm439_vm9 }
  0xdc   :  { %v435_v24 = vsub.f32 1.0, %v434_v25  ;;  %vm420_vm7 = vmor %vm418_vm5, %vm419_vm4  ;;  %v450_v37 = vmul.f32 %v784_v29, %v407_v31 }
  0xdd   :  { %v415_v8 = vsub.f32 1.0, %v414_v21 }
  0xde   :  { %v436_v33 = vmul.f32 %v780_v5, %v435_v24 }
  0xdf   :  { %v416_v16 = vmul.f32 %v782_v19, %v415_v8 }
  0xe0   :  { %v437_v40 = vadd.f32 %v780_v5, %v436_v33 }
  0xe1   :  { %v417_v28 = vadd.f32 %v782_v19, %v416_v16 }
  0xe2   :  { %v441_v43 = vsel %vm440_vm11, %v780_v5, %v437_v40 }
  0xe3   :  { %v421_v32 = vsel %vm420_vm7, %v782_v19, %v417_v28  ;;  %v446_v47 = vsel %vm443_vm12, %v445_v44, %v441_v43 }
  0xe4   :  { %v426_v34 = vsel %vm423_vm8, %v425_v30, %v421_v32 }
  0xe5   :  { %v449_v36 = vmul.f32 0.0, %v426_v34 }
  0xe7   :  { %v1319_v39 = vadd.f32 %v450_v37, %v449_v36 }
  0xe9   :  { %785 = vtanh.f32 %v1319_v39 }
  0xef   :  { %v786_v46 = vpop.eup %785 }
  0xf0   :  { %v453_v48 = vmul.f32 %v786_v46, %v446_v47 }
  0xf2   :  { %542 = vmatmul.f32.vlgmr.msrb.gmra.mxu0 %v453_v48  ;;  %562 = vmatmul.f32.vlgmr.msrb.gmra.mxu1 %v453_v48 }
  0xf3   :  { %582 = vmatmul.f32.vlgmr.msra.gmra.mxu2 %v453_v48  ;;  %602 = vmatmul.f32.vlgmr.msra.gmra.mxu3 %v453_v48 }
  0xfa   :  { %715 = vmatmul.f32.vlgmr.msra.gmra.mxu0 %v453_v48 }
 0x16f   :  { %v543_v49 = vpop.f32.mrf.mxu0  ;;  %v563_v50 = vpop.f32.mrf.mxu1 }
 0x170   :  { %v606_v51 = vadd.f32 %v543_v49, %v1301_v18  ;;  %v607_v52 = vadd.f32 %v563_v50, %v1307_v38 }
 0x172   :  { %v756_v53 = vmul.f32 -1.442695, %v606_v51  ;;  %v757_v54 = vmul.f32 -1.442695, %v607_v52 }
 0x174   :  { %787 = vpow2.f32 %v756_v53 }
 0x175   :  { %789 = vpow2.f32 %v757_v54 }
 0x176   :  { %v603_v56 = vpop.f32.mrf.mxu3  ;;  %v583_v63 = vpop.f32.mrf.mxu2 }
 0x177   :  { %v609_v57 = vadd.f32 %v603_v56, %v1305_v35  ;;  %v716_v58 = vpop.f32.mrf.mxu0  ;;  %v608_v4 = vadd.f32 %v583_v63, %v1312_v45 }
 0x178   :  { %v717_v59 = vadd.f32 %v1327_v55, %v716_v58 }
 0x179   :  { %v758_v60 = vmul.f32 -1.442695, %v609_v57 }
 0x17a   :  { %v788_v61 = vpop.eup %787  ;;  %722 = vst [vmem:[#allocation15] sm:$0xff] %v717_v59 }
 0x17b   :  { %v790_v18 = vpop.eup %789  ;;  %v613_v38 = vadd.f32 1.0, %v788_v61  ;;  %791 = vpow2.f32 %v758_v60 }
 0x17c   :  { %v632_v62 = vadd.f32 1.0, %v790_v18 }
 0x17d   :  { %793 = vrcp.f32 %v613_v38  ;;  %v625_v11 = vand.u32 2147483648, %v613_v38  ;;  %v623_v17 = vand.u32 2147483647, %v613_v38  ;;  %vm619_vm15 = vweird.f32 %v613_v38 }
 0x17e   :  { %795 = vrcp.f32 %v632_v62  ;;  %v644_v13 = vand.u32 2147483648, %v632_v62  ;;  %v642_v5 = vand.u32 2147483647, %v632_v62  ;;  %vm638_vm0 = vweird.f32 %v632_v62 }
 0x17f   :  { %v626_v45 = vor.u32 1.1754944e-38, %v625_v11  ;;  %vm624_vm2 = vcmp.eq.f32.partialorder %v623_v17, 8.507059e+37 }
 0x180   :  { %v645_v27 = vor.u32 1.1754944e-38, %v644_v13  ;;  %vm643_vm4 = vcmp.eq.f32.partialorder %v642_v5, 8.507059e+37 }
 0x181   :  { %v792_v0 = vpop.eup %791 }
 0x182   :  { %v652_v1 = vadd.f32 1.0, %v792_v0 }
 0x183   :  { %v794_v3 = vpop.eup %793 }
 0x184   :  { %v796_v6 = vpop.eup %795  ;;  %v615_v35 = vmul.f32 %v794_v3, %v613_v38  ;;  %797 = vrcp.f32 %v652_v1  ;;  %vm620_vm13 = vweird.f32 %v794_v3  ;;  %v664_v31 = vand.u32 2147483648, %v652_v1 }
 0x185   :  { %v634_v7 = vmul.f32 %v796_v6, %v632_v62  ;;  %799 = vtanh.f32 %v608_v4  ;;  %vm639_vm14 = vweird.f32 %v796_v6  ;;  %vm621_vm1 = vmor %vm619_vm15, %vm620_vm13  ;;  %vm658_vm6 = vweird.f32 %v652_v1 }
 0x186   :  { %v616_v9 = vsub.f32 1.0, %v615_v35  ;;  %vm640_vm3 = vmor %vm638_vm0, %vm639_vm14  ;;  %v662_v32 = vand.u32 2147483647, %v652_v1  ;;  %v665_v34 = vor.u32 1.1754944e-38, %v664_v31 }
 0x187   :  { %v635_v10 = vsub.f32 1.0, %v634_v7 }
 0x188   :  { %v617_v15 = vmul.f32 %v794_v3, %v616_v9  ;;  %vm663_vm8 = vcmp.eq.f32.partialorder %v662_v32, 8.507059e+37 }
 0x189   :  { %v636_v2 = vmul.f32 %v796_v6, %v635_v10 }
 0x18a   :  { %v798_v19 = vpop.eup %797  ;;  %v618_v21 = vadd.f32 %v794_v3, %v617_v15 }
 0x18b   :  { %v637_v23 = vadd.f32 %v796_v6, %v636_v2  ;;  %v654_v25 = vmul.f32 %v798_v19, %v652_v1  ;;  %v800_v12 = vpop.eup %799  ;;  %vm659_vm5 = vweird.f32 %v798_v19 }
 0x18c   :  { %v622_v8 = vsel %vm621_vm1, %v794_v3, %v618_v21  ;;  %vm660_vm7 = vmor %vm658_vm6, %vm659_vm5 }
 0x18d   :  { %v627_v14 = vsel %vm624_vm2, %v626_v45, %v622_v8  ;;  %v641_v16 = vsel %vm640_vm3, %v796_v6, %v637_v23  ;;  %v655_v20 = vsub.f32 1.0, %v654_v25 }
 0x18e   :  { %v670_v22 = vmul.f32 %v800_v12, %v627_v14  ;;  %v646_v24 = vsel %vm643_vm4, %v645_v27, %v641_v16 }
 0x18f   :  { %v656_v26 = vmul.f32 %v798_v19, %v655_v20  ;;  %v669_v28 = vmul.f32 %v646_v24, %v1319_v39 }
 0x191   :  { %v671_v29 = vadd.f32 %v670_v22, %v669_v28  ;;  %v657_v30 = vadd.f32 %v798_v19, %v656_v26 }
 0x193   :  { %801 = vtanh.f32 %v671_v29  ;;  %v661_v33 = vsel %vm660_vm7, %v798_v19, %v657_v30 }
 0x194   :  { %v666_v37 = vsel %vm663_vm8, %v665_v34, %v661_v33 }
 0x199   :  { %v802_v36 = vpop.eup %801 }
 0x19a   :  { %v673_v40 = vmul.f32 %v802_v36, %v666_v37 }
 0x19c   :  { %718 = vmatmul.f32.gmra.mxu0 %v673_v40 }
 0x219   :  { %v719_v39 = vpop.f32.mrf.mxu0 }
 0x21a   :  { %v720_v41 = vadd.f32 %v1327_v55, %v719_v39 }
 0x21c   :  { %723 = vst [vmem:[#allocation15 + $0x8] sm:$0xff] %v720_v41 }
 0x21d   :  { %736 = dma.vmem_to_hbm [thread:$0]  %s729_s23, 256, %s731_s26, [#allocation8], %s960_s15, %s960_s15, %s961_s16  }
 0x21e   :  { %953 = dma.done.wait [#allocation8], 256  }
 0x21f   :  { %954 = vsyncadd [#allocation8], 4294967040 }
 0x220   :  { %741 = vsyncpa [#allocation7], 1 }
 0x221   :  { %742 = vsyncpa [#allocation10], 1 }
 0x222   :  { %743 = vsyncpa [#allocation13], 1 }
 0x223   :  { %744 = vsyncpa [#allocation8], 1 }

</bundles_post_ra>
